<compile_context>
chip_gen: v5e
topology: v5e:2x2
jax: 0.10.0
libtpu: 0.0.40
codegen_flags: <defaults>
</compile_context>

<pallas_src>
import jax
import jax.numpy as jnp
from jax import lax
from jax.experimental import pallas as pl
from jax.experimental.pallas import tpu as pltpu


PARAM_ORDER = ["enc_w1", "enc_b1", "enc_w2", "enc_b2",
               "mean_w", "mean_b", "var_w", "var_b",
               "dec_w1", "dec_b1", "dec_w2", "dec_b2", "dec_w3", "dec_b3",
               "td1_w", "td1_b", "td2_w", "td2_b"]


# --------------------------- deterministic params ---------------------------

def init_params(key, feat_dim, hidden_dim, latent_dim, z_dim, trend_poly):
    """PyTorch-layout parameters: Conv1d weights (Cout, Cin, K), Linear (out, in)."""
    F, H, L, Z, P = feat_dim, hidden_dim, latent_dim, z_dim, trend_poly
    FP = F * P
    shapes = {
        "enc_w1": (H, F, 3), "enc_b1": (H,),
        "enc_w2": (L, H, 3), "enc_b2": (L,),
        "mean_w": (Z, L, 1), "mean_b": (Z,),
        "var_w":  (Z, L, 1), "var_b":  (Z,),
        "dec_w1": (L, Z, 3), "dec_b1": (L,),
        "dec_w2": (H, L, 3), "dec_b2": (H,),
        "dec_w3": (F, H, 3), "dec_b3": (F,),
        "td1_w":  (FP, Z),   "td1_b":  (FP,),
        "td2_w":  (FP, FP),  "td2_b":  (FP,),
    }
    keys = jax.random.split(key, len(PARAM_ORDER))
    return {name: 0.1 * jax.random.normal(k, shapes[name], jnp.float32)
            for k, name in zip(keys, PARAM_ORDER)}


# ----------------------- packed-weight layout (static) -----------------------

def _weight_layout(F, H, L, Z, P):
    """Row offsets / real row counts / real contraction sizes for every weight
    block in the single packed weight ref.  Row offsets are multiples of 16 so
    bf16 sublane packing never straddles a block seam."""
    FP = F * P
    entries = [("enc1", H,      3 * F + 1),
               ("enc2", L,      3 * H + 1),
               ("mv",   2 * Z,  L + 1),
               ("dec1", L,      3 * Z + 1),
               ("dec2", H,      3 * L + 1),
               ("dec3", F,      3 * H + 1),
               ("td1",  FP,     Z + 1),
               ("td2",  FP,     FP + 1)]
    layout, off = {}, 0
    for name, cout, k in entries:
        layout[name] = (off, cout, k)
        off += ((cout + 15) // 16) * 16          # pad rows to multiple of 16
    kmax = max(k for _, _, k in entries)
    kpad = ((kmax + 127) // 128) * 128           # pad contraction dim to 128
    return layout, off, kpad


def pack_params(params):
    """One-time host-side re-layout:
       * conv taps fused along the contraction dim: (Cout, Cin, 3) -> (Cout, 3*Cin)
       * mean/var heads fused into one (2Z, L) block
       * trend_dense2 rows permuted to p-major (enables VPU poly mixing)
       * bias appended as an extra weight column (folded into the MXU dot)
       * everything packed into a single zero-padded bf16 (rows, 128) array."""
    H, F, _ = params["enc_w1"].shape
    L = params["enc_w2"].shape[0]
    Z = params["mean_w"].shape[0]
    FP = params["td1_w"].shape[0]
    P = FP // F
    layout, rtot, kpad = _weight_layout(F, H, L, Z, P)

    def conv_w(w):   # (Cout, Cin, 3) -> (Cout, 3*Cin); tap-k block at cols [k*Cin:(k+1)*Cin]
        Cout, Cin, K = w.shape
        return jnp.transpose(w, (0, 2, 1)).reshape(Cout, K * Cin)

    # p-major reorder of trend_dense2 output rows: new row p*F+d == old row d*P+p
    idx = jnp.arange(FP)
    old_rows = (idx % F) * P + (idx // F)

    blocks = {
        "enc1": (conv_w(params["enc_w1"]), params["enc_b1"]),
        "enc2": (conv_w(params["enc_w2"]), params["enc_b2"]),
        "mv":   (jnp.concatenate([params["mean_w"][:, :, 0],
                                  params["var_w"][:, :, 0]], axis=0),
                 jnp.concatenate([params["mean_b"], params["var_b"]])),
        "dec1": (conv_w(params["dec_w1"]), params["dec_b1"]),
        "dec2": (conv_w(params["dec_w2"]), params["dec_b2"]),
        "dec3": (conv_w(params["dec_w3"]), params["dec_b3"]),
        "td1":  (params["td1_w"], params["td1_b"]),
        "td2":  (params["td2_w"][old_rows, :], params["td2_b"][old_rows]),
    }

    wpack = jnp.zeros((rtot, kpad), jnp.float32)
    for name, (w, b) in blocks.items():
        off, cout, k = layout[name]
        wb = jnp.concatenate([w, b.reshape(-1, 1)], axis=1)     # (Cout, K)
        wpack = wpack.at[off:off + cout, 0:k].set(wb)
    return wpack.astype(jnp.bfloat16)                            # (rtot, 128)


# ------------------------------ pallas forward -------------------------------

def make_forward(feat_dim, hidden_dim, latent_dim, z_dim, trend_poly,
                 seq_len, batch, target_lanes=256):
    """Build a jitted forward(x, eps, wpack) -> (x_hat, mean, var)."""
    F, H, L, Z, P, T, B = (feat_dim, hidden_dim, latent_dim, z_dim,
                           trend_poly, seq_len, batch)
    layout, rtot, kpad = _weight_layout(F, H, L, Z, P)

    # Lane-width policy: prefer one wide step (overhead/latency-bound kernel).
    Bb = max(1, min(B, target_lanes // T))
    while B % Bb:
        Bb -= 1
    nb = B // Bb
    N = Bb * T
    assert N % 128 == 0, "lane axis must be a multiple of 128 for unmasked stores"
    # For nb >= 2 on v7x, the single "parallel" axis can be promoted to
    # core-parallel to land the two steps on both TensorCores; at nb == 1 the
    # kernel is a single wide step, which is the right shape for v5e/v6e.

    bf16, f32 = jnp.bfloat16, jnp.float32

    def kernel(x_ref, eps_ref, w_ref, out_ref, mv_ref):
        xb = x_ref[...]                      # (F, N)  f32
        eb = eps_ref[...]                    # (Z, N)  f32

        # Hoisted per-step constants: sequence-boundary lane masks, (t/T) base,
        # and the ones row used for the folded-bias column.
        lane_t = lax.broadcasted_iota(jnp.int32, (1, N), 1) % T
        mask_l = (lane_t > 0).astype(f32)          # valid lanes for h[t-1]
        mask_r = (lane_t < T - 1).astype(f32)      # valid lanes for h[t+1]
        lin = lane_t.astype(f32) * (1.0 / T)       # (1, N) polynomial base
        ones_row = jnp.ones((1, N), f32)

        def wslice(name):
            off, cout, k = layout[name]
            return w_ref[pl.ds(off, cout), pl.ds(0, k)]      # (Cout, K) bf16

        def conv3(h, name):
            # Fused 3-tap conv + bias: single (Cout, 3*Cin+1) @ (3*Cin+1, N) dot.
            hm1 = pltpu.roll(h, shift=1, axis=1) * mask_l        # h[t-1]
            hp1 = pltpu.roll(h, shift=N - 1, axis=1) * mask_r    # h[t+1]
            hcat = jnp.concatenate([hm1, h, hp1, ones_row], axis=0).astype(bf16)
            return jnp.dot(wslice(name), hcat, preferred_element_type=f32)

        def dense(h, name):
            # 1x1 conv / linear + folded bias: (Cout, Cin+1) @ (Cin+1, N) dot.
            hcat = jnp.concatenate([h, ones_row], axis=0).astype(bf16)
            return jnp.dot(wslice(name), hcat, preferred_element_type=f32)

        # ---- encoder: conv3 -> relu -> conv3 -> relu ----
        h = jnp.maximum(conv3(xb, "enc1"), 0.0)                   # (H, N)
        h = jnp.maximum(conv3(h, "enc2"), 0.0)                    # (L, N)

        # ---- fused mean/var 1x1-conv heads ----
        mv = dense(h, "mv")                                       # (2Z, N)
        mean = mv[0:Z, :]
        var = mv[Z:2 * Z, :]

        # ---- reparameterization (matches PyTorch: z = mean + var * eps) ----
        z = mean + var * eb                                       # (Z, N)

        # ---- decoder: conv3 -> relu -> conv3 -> relu -> conv3 ----
        d = jnp.maximum(conv3(z, "dec1"), 0.0)                    # (L, N)
        d = jnp.maximum(conv3(d, "dec2"), 0.0)                    # (H, N)
        x_hat = conv3(d, "dec3")                                  # (F, N)

        # ---- trend MLP: linear -> relu -> linear (p-major rows) ----
        tp = jnp.maximum(dense(z, "td1"), 0.0)                    # (F*P, N)
        tp = dense(tp, "td2")                                     # (F*P, N)

        # ---- polynomial mixing on the VPU: trend[d] = sum_p tp[p*F+d]*(t/T)^p ----
        trend = tp[0:F, :]
        poly = lin
        for q in range(1, P):
            trend = trend + tp[q * F:(q + 1) * F, :] * poly
            poly = poly * lin

        out_ref[...] = (x_hat + trend).astype(out_ref.dtype)
        mv_ref[...] = mv.astype(mv_ref.dtype)

    def fwd(x, eps, wpack):
        # (B, T, C) -> (nb, C, Bb*T): channels on sublanes, batch*time on lanes.
        # Pure layout plumbing inside the jit; keep the lane-dense layout across
        # the surrounding model to elide it entirely.
        def to_lane(a):
            C = a.shape[-1]
            return a.reshape(nb, Bb, T, C).transpose(0, 3, 1, 2).reshape(nb, C, N)

        def from_lane(a):
            C = a.shape[1]
            return a.reshape(nb, C, Bb, T).transpose(0, 2, 3, 1).reshape(B, T, C)

        x_lane = to_lane(x)
        eps_lane = to_lane(eps)

        out_l, mv_l = pl.pallas_call(
            kernel,
            out_shape=(jax.ShapeDtypeStruct((nb, F, N), x.dtype),
                       jax.ShapeDtypeStruct((nb, 2 * Z, N), x.dtype)),
            grid_spec=pltpu.PrefetchScalarGridSpec(
                num_scalar_prefetch=0,
                grid=(nb,),
                in_specs=[pl.BlockSpec((None, F, N), lambda g: (g, 0, 0)),
                          pl.BlockSpec((None, Z, N), lambda g: (g, 0, 0)),
                          pl.BlockSpec((rtot, kpad), lambda g: (0, 0))],
                out_specs=[pl.BlockSpec((None, F, N), lambda g: (g, 0, 0)),
                           pl.BlockSpec((None, 2 * Z, N), lambda g: (g, 0, 0))]),
            # VMEM use is tiny (~0.3 MiB incl. the 48 KiB packed weights); if
            # the model is scaled up, budget against v7x's 64 MiB and set
            # vmem_limit_bytes explicitly.
            compiler_params=pltpu.CompilerParams(
                dimension_semantics=("parallel",)),
        )(x_lane, eps_lane, wpack)

        out = from_lane(out_l)
        mv = from_lane(mv_l)                      # (B, T, 2Z)
        return out, mv[..., :Z], mv[..., Z:]

    return jax.jit(fwd)


# ------------------------------ JAX reference --------------------------------

def reference_forward(x, eps, p, trend_poly):
    """Pure-JAX reference for the PyTorch Trend_Vae forward, using the same
    bf16 matmul operands / bf16-stored biases / f32 accumulation as the kernel."""
    f32, bf16 = jnp.float32, jnp.bfloat16

    def conv3(h, w, b):                 # h: (B,T,Cin), w: (Cout,Cin,3), b: (Cout,)
        T = h.shape[1]
        hp = jnp.pad(h, ((0, 0), (1, 1), (0, 0)))
        y = 0.0
        for k in range(3):
            y = y + jnp.einsum("btc,oc->bto",
                               hp[:, k:k + T, :].astype(bf16),
                               w[:, :, k].astype(bf16),
                               preferred_element_type=f32)
        return y + b.astype(bf16)

    h = jax.nn.relu(conv3(x, p["enc_w1"], p["enc_b1"]))
    h = jax.nn.relu(conv3(h, p["enc_w2"], p["enc_b2"]))
    mean = jnp.einsum("btc,oc->bto", h.astype(bf16), p["mean_w"][:, :, 0].astype(bf16),
                      preferred_element_type=f32) + p["mean_b"].astype(bf16)
    var = jnp.einsum("btc,oc->bto", h.astype(bf16), p["var_w"][:, :, 0].astype(bf16),
                     preferred_element_type=f32) + p["var_b"].astype(bf16)
    z = mean + var * eps
    d = jax.nn.relu(conv3(z, p["dec_w1"], p["dec_b1"]))
    d = jax.nn.relu(conv3(d, p["dec_w2"], p["dec_b2"]))
    x_hat = conv3(d, p["dec_w3"], p["dec_b3"])

    B, T, F = x.shape
    Z = z.shape[-1]
    P = trend_poly
    zf = z.reshape(B * T, Z)
    tp = jax.nn.relu(jnp.einsum("ni,oi->no", zf.astype(bf16), p["td1_w"].astype(bf16),
                                preferred_element_type=f32) + p["td1_b"].astype(bf16))
    tp = jnp.einsum("ni,oi->no", tp.astype(bf16), p["td2_w"].astype(bf16),
                    preferred_element_type=f32) + p["td2_b"].astype(bf16)
    tp = tp.reshape(B, T, F, P)
    lin = jnp.arange(T, dtype=f32) / T
    poly = jnp.stack([lin ** float(q) for q in range(P)], axis=0)   # (P, T)
    trend = jnp.einsum("btdp,pt->btd", tp, poly)
    return x_hat + trend, mean, var


# ----------------------------------- main ------------------------------------

if __name__ == "__main__":
    # One grid step carrying Bb=16 sequences (Bb*T = 256 lanes): this tiny
    # kernel is latency-bound, so fewer/wider steps beat more steps.
    B, T, F = 16, 16, 8         # batch, seq_len, feat_dim
    H, L, Z, P = 32, 32, 8, 2   # hidden_dim, latent_dim, z_dim, trend_poly

    key = jax.random.PRNGKey(0)
    kx, keps, kp = jax.random.split(key, 3)
    x = jax.random.normal(kx, (B, T, F), jnp.float32)
    # torch.randn_like epsilon replaced by a deterministic jax.random draw
    eps = jax.random.normal(keps, (B, T, Z), jnp.float32)
    params = init_params(kp, F, H, L, Z, P)

    wpack = pack_params(params)                       # once, off the hot path
    forward = make_forward(F, H, L, Z, P, T, B)       # jitted wrapper

    out, mean, var = forward(x, eps, wpack)
    jax.block_until_ready((out, mean, var))

    ref_out, ref_mean, ref_var = reference_forward(x, eps, params, P)
    assert jnp.allclose(out, ref_out, rtol=2e-3, atol=2e-3)
    assert jnp.allclose(mean, ref_mean, rtol=2e-3, atol=2e-3)
    assert jnp.allclose(var, ref_var, rtol=2e-3, atol=2e-3)

    print("KERNEL_OK")
</pallas_src>

<mosaic_0001>
module attributes {stable_mosaic.version = 11 : i64} {
  func.func @kernel(%arg0: i32, %arg1: memref<1x8x256xf32, #tpu.memory_space<vmem>>, %arg2: memref<1x8x256xf32, #tpu.memory_space<vmem>>, %arg3: memref<192x128xbf16, #tpu.memory_space<vmem>>, %arg4: memref<1x8x256xf32, #tpu.memory_space<vmem>>, %arg5: memref<1x16x256xf32, #tpu.memory_space<vmem>>) attributes {dimension_semantics = [#tpu.dimension_semantics<parallel>], iteration_bounds = array<i64: 1>, scalar_prefetch = 0 : i64, scratch_operands = 0 : i64, tpu.core_type = #tpu.core_type<tc>, window_params = [{transform_indices = @transform_0, window_bounds = array<i64: 1, 8, 256>}, {transform_indices = @transform_1, window_bounds = array<i64: 1, 8, 256>}, {pipeline_mode = #tpu.pipeline_mode<synchronous>, transform_indices = @transform_2, window_bounds = array<i64: 192, 128>}, {transform_indices = @transform_3, window_bounds = array<i64: 1, 8, 256>}, {transform_indices = @transform_4, window_bounds = array<i64: 1, 16, 256>}]} {
    %c0 = arith.constant 0 : index
    %c0_0 = arith.constant 0 : index
    %c0_1 = arith.constant 0 : index
    %0 = vector.load %arg1[%c0, %c0_0, %c0_1] : memref<1x8x256xf32, #tpu.memory_space<vmem>>, vector<1x8x256xf32>
    %1 = vector.shape_cast %0 : vector<1x8x256xf32> to vector<8x256xf32>
    %c0_2 = arith.constant 0 : index
    %c0_3 = arith.constant 0 : index
    %c0_4 = arith.constant 0 : index
    %2 = vector.load %arg2[%c0_2, %c0_3, %c0_4] : memref<1x8x256xf32, #tpu.memory_space<vmem>>, vector<1x8x256xf32>
    %3 = vector.shape_cast %2 : vector<1x8x256xf32> to vector<8x256xf32>
    %4 = tpu.iota {dimensions = array<i32: 1>} : vector<1x256xi32>
    %c16_i32 = arith.constant 16 : i32
    %c0_i32 = arith.constant 0 : i32
    %5 = arith.cmpi eq, %c16_i32, %c0_i32 : i32
    %c1_i32 = arith.constant 1 : i32
    %6 = arith.select %5, %c1_i32, %c16_i32 : i32
    %7 = vector.broadcast %6 : i32 to vector<1x256xi32>
    %8 = arith.remsi %4, %7 : vector<1x256xi32>
    %c0_i32_5 = arith.constant 0 : i32
    %9 = vector.broadcast %c0_i32_5 : i32 to vector<1x256xi32>
    %10 = arith.cmpi ne, %8, %9 : vector<1x256xi32>
    %c0_i32_6 = arith.constant 0 : i32
    %11 = vector.broadcast %c0_i32_6 : i32 to vector<1x256xi32>
    %12 = arith.cmpi slt, %8, %11 : vector<1x256xi32>
    %c0_i32_7 = arith.constant 0 : i32
    %13 = arith.cmpi slt, %6, %c0_i32_7 : i32
    %14 = vector.broadcast %13 : i1 to vector<1x256xi1>
    %15 = vector.broadcast %14 : vector<1x256xi1> to vector<1x256xi1>
    %16 = arith.xori %12, %15 : vector<1x256xi1>
    %17 = arith.andi %16, %10 : vector<1x256xi1>
    %18 = vector.broadcast %6 : i32 to vector<1x256xi32>
    %19 = arith.addi %8, %18 : vector<1x256xi32>
    %20 = arith.select %17, %19, %8 : vector<1x256xi1>, vector<1x256xi32>
    %c0_i32_8 = arith.constant 0 : i32
    %21 = vector.broadcast %c0_i32_8 : i32 to vector<1x256xi32>
    %22 = arith.cmpi sgt, %20, %21 : vector<1x256xi32>
    %23 = arith.extui %22 : vector<1x256xi1> to vector<1x256xi32>
    %24 = arith.sitofp %23 : vector<1x256xi32> to vector<1x256xf32>
    %c15_i32 = arith.constant 15 : i32
    %25 = vector.broadcast %c15_i32 : i32 to vector<1x256xi32>
    %26 = arith.cmpi slt, %20, %25 : vector<1x256xi32>
    %27 = arith.extui %26 : vector<1x256xi1> to vector<1x256xi32>
    %28 = arith.sitofp %27 : vector<1x256xi32> to vector<1x256xf32>
    %29 = arith.sitofp %20 : vector<1x256xi32> to vector<1x256xf32>
    %cst = arith.constant 6.250000e-02 : f32
    %30 = vector.broadcast %cst : f32 to vector<1x256xf32>
    %31 = arith.mulf %29, %30 : vector<1x256xf32>
    %cst_9 = arith.constant 1.000000e+00 : f32
    %32 = vector.broadcast %cst_9 : f32 to vector<1x256xf32>
    %c1_i32_10 = arith.constant 1 : i32
    %33 = tpu.dynamic_rotate %1 by %c1_i32_10 dim 1 : vector<8x256xf32>, i32 -> vector<8x256xf32>
    %34 = vector.broadcast %24 : vector<1x256xf32> to vector<8x256xf32>
    %35 = arith.mulf %33, %34 : vector<8x256xf32>
    %c255_i32 = arith.constant 255 : i32
    %36 = tpu.dynamic_rotate %1 by %c255_i32 dim 1 : vector<8x256xf32>, i32 -> vector<8x256xf32>
    %37 = vector.broadcast %28 : vector<1x256xf32> to vector<8x256xf32>
    %38 = arith.mulf %36, %37 : vector<8x256xf32>
    %39 = tpu.concatenate %35, %1, %38, %32 in 0 : vector<8x256xf32>, vector<8x256xf32>, vector<8x256xf32>, vector<1x256xf32> -> vector<25x256xf32>
    %40 = arith.truncf %39 : vector<25x256xf32> to vector<25x256xbf16>
    %c0_11 = arith.constant 0 : index
    %c0_12 = arith.constant 0 : index
    %41 = vector.load %arg3[%c0_11, %c0_12] : memref<192x128xbf16, #tpu.memory_space<vmem>>, vector<32x25xbf16>
    %cst_13 = arith.constant dense<0.000000e+00> : vector<32x256xf32>
    %42 = tpu.matmul %41, %40, %cst_13 {dimension_numbers = #tpu.dot_dimension_numbers<[1], [0], [0], [1], [0, 0, 1, 1], [], []>} : vector<32x25xbf16>, vector<25x256xbf16>, vector<32x256xf32> -> vector<32x256xf32>
    %cst_14 = arith.constant 0.000000e+00 : f32
    %43 = vector.broadcast %cst_14 : f32 to vector<32x256xf32>
    %44 = arith.maximumf %42, %43 : vector<32x256xf32>
    %c1_i32_15 = arith.constant 1 : i32
    %45 = tpu.dynamic_rotate %44 by %c1_i32_15 dim 1 : vector<32x256xf32>, i32 -> vector<32x256xf32>
    %46 = vector.broadcast %24 : vector<1x256xf32> to vector<32x256xf32>
    %47 = arith.mulf %45, %46 : vector<32x256xf32>
    %c255_i32_16 = arith.constant 255 : i32
    %48 = tpu.dynamic_rotate %44 by %c255_i32_16 dim 1 : vector<32x256xf32>, i32 -> vector<32x256xf32>
    %49 = vector.broadcast %28 : vector<1x256xf32> to vector<32x256xf32>
    %50 = arith.mulf %48, %49 : vector<32x256xf32>
    %51 = tpu.concatenate %47, %44, %50, %32 in 0 : vector<32x256xf32>, vector<32x256xf32>, vector<32x256xf32>, vector<1x256xf32> -> vector<97x256xf32>
    %52 = arith.truncf %51 : vector<97x256xf32> to vector<97x256xbf16>
    %c32 = arith.constant 32 : index
    %c0_17 = arith.constant 0 : index
    %53 = vector.load %arg3[%c32, %c0_17] : memref<192x128xbf16, #tpu.memory_space<vmem>>, vector<32x97xbf16>
    %cst_18 = arith.constant dense<0.000000e+00> : vector<32x256xf32>
    %54 = tpu.matmul %53, %52, %cst_18 {dimension_numbers = #tpu.dot_dimension_numbers<[1], [0], [0], [1], [0, 0, 1, 1], [], []>} : vector<32x97xbf16>, vector<97x256xbf16>, vector<32x256xf32> -> vector<32x256xf32>
    %cst_19 = arith.constant 0.000000e+00 : f32
    %55 = vector.broadcast %cst_19 : f32 to vector<32x256xf32>
    %56 = arith.maximumf %54, %55 : vector<32x256xf32>
    %57 = tpu.concatenate %56, %32 in 0 : vector<32x256xf32>, vector<1x256xf32> -> vector<33x256xf32>
    %58 = arith.truncf %57 : vector<33x256xf32> to vector<33x256xbf16>
    %c64 = arith.constant 64 : index
    %c0_20 = arith.constant 0 : index
    %59 = vector.load %arg3[%c64, %c0_20] : memref<192x128xbf16, #tpu.memory_space<vmem>>, vector<16x33xbf16>
    %cst_21 = arith.constant dense<0.000000e+00> : vector<16x256xf32>
    %60 = tpu.matmul %59, %58, %cst_21 {dimension_numbers = #tpu.dot_dimension_numbers<[1], [0], [0], [1], [0, 0, 1, 1], [], []>} : vector<16x33xbf16>, vector<33x256xbf16>, vector<16x256xf32> -> vector<16x256xf32>
    %61 = vector.extract_strided_slice %60 {offsets = [0, 0], sizes = [8, 256], strides = [1, 1]} : vector<16x256xf32> to vector<8x256xf32>
    %62 = vector.extract_strided_slice %60 {offsets = [8, 0], sizes = [8, 256], strides = [1, 1]} : vector<16x256xf32> to vector<8x256xf32>
    %63 = arith.mulf %62, %3 : vector<8x256xf32>
    %64 = arith.addf %61, %63 : vector<8x256xf32>
    %c1_i32_22 = arith.constant 1 : i32
    %65 = tpu.dynamic_rotate %64 by %c1_i32_22 dim 1 : vector<8x256xf32>, i32 -> vector<8x256xf32>
    %66 = vector.broadcast %24 : vector<1x256xf32> to vector<8x256xf32>
    %67 = arith.mulf %65, %66 : vector<8x256xf32>
    %c255_i32_23 = arith.constant 255 : i32
    %68 = tpu.dynamic_rotate %64 by %c255_i32_23 dim 1 : vector<8x256xf32>, i32 -> vector<8x256xf32>
    %69 = vector.broadcast %28 : vector<1x256xf32> to vector<8x256xf32>
    %70 = arith.mulf %68, %69 : vector<8x256xf32>
    %71 = tpu.concatenate %67, %64, %70, %32 in 0 : vector<8x256xf32>, vector<8x256xf32>, vector<8x256xf32>, vector<1x256xf32> -> vector<25x256xf32>
    %72 = arith.truncf %71 : vector<25x256xf32> to vector<25x256xbf16>
    %c80 = arith.constant 80 : index
    %c0_24 = arith.constant 0 : index
    %73 = vector.load %arg3[%c80, %c0_24] : memref<192x128xbf16, #tpu.memory_space<vmem>>, vector<32x25xbf16>
    %cst_25 = arith.constant dense<0.000000e+00> : vector<32x256xf32>
    %74 = tpu.matmul %73, %72, %cst_25 {dimension_numbers = #tpu.dot_dimension_numbers<[1], [0], [0], [1], [0, 0, 1, 1], [], []>} : vector<32x25xbf16>, vector<25x256xbf16>, vector<32x256xf32> -> vector<32x256xf32>
    %cst_26 = arith.constant 0.000000e+00 : f32
    %75 = vector.broadcast %cst_26 : f32 to vector<32x256xf32>
    %76 = arith.maximumf %74, %75 : vector<32x256xf32>
    %c1_i32_27 = arith.constant 1 : i32
    %77 = tpu.dynamic_rotate %76 by %c1_i32_27 dim 1 : vector<32x256xf32>, i32 -> vector<32x256xf32>
    %78 = vector.broadcast %24 : vector<1x256xf32> to vector<32x256xf32>
    %79 = arith.mulf %77, %78 : vector<32x256xf32>
    %c255_i32_28 = arith.constant 255 : i32
    %80 = tpu.dynamic_rotate %76 by %c255_i32_28 dim 1 : vector<32x256xf32>, i32 -> vector<32x256xf32>
    %81 = vector.broadcast %28 : vector<1x256xf32> to vector<32x256xf32>
    %82 = arith.mulf %80, %81 : vector<32x256xf32>
    %83 = tpu.concatenate %79, %76, %82, %32 in 0 : vector<32x256xf32>, vector<32x256xf32>, vector<32x256xf32>, vector<1x256xf32> -> vector<97x256xf32>
    %84 = arith.truncf %83 : vector<97x256xf32> to vector<97x256xbf16>
    %c112 = arith.constant 112 : index
    %c0_29 = arith.constant 0 : index
    %85 = vector.load %arg3[%c112, %c0_29] : memref<192x128xbf16, #tpu.memory_space<vmem>>, vector<32x97xbf16>
    %cst_30 = arith.constant dense<0.000000e+00> : vector<32x256xf32>
    %86 = tpu.matmul %85, %84, %cst_30 {dimension_numbers = #tpu.dot_dimension_numbers<[1], [0], [0], [1], [0, 0, 1, 1], [], []>} : vector<32x97xbf16>, vector<97x256xbf16>, vector<32x256xf32> -> vector<32x256xf32>
    %cst_31 = arith.constant 0.000000e+00 : f32
    %87 = vector.broadcast %cst_31 : f32 to vector<32x256xf32>
    %88 = arith.maximumf %86, %87 : vector<32x256xf32>
    %c1_i32_32 = arith.constant 1 : i32
    %89 = tpu.dynamic_rotate %88 by %c1_i32_32 dim 1 : vector<32x256xf32>, i32 -> vector<32x256xf32>
    %90 = vector.broadcast %24 : vector<1x256xf32> to vector<32x256xf32>
    %91 = arith.mulf %89, %90 : vector<32x256xf32>
    %c255_i32_33 = arith.constant 255 : i32
    %92 = tpu.dynamic_rotate %88 by %c255_i32_33 dim 1 : vector<32x256xf32>, i32 -> vector<32x256xf32>
    %93 = vector.broadcast %28 : vector<1x256xf32> to vector<32x256xf32>
    %94 = arith.mulf %92, %93 : vector<32x256xf32>
    %95 = tpu.concatenate %91, %88, %94, %32 in 0 : vector<32x256xf32>, vector<32x256xf32>, vector<32x256xf32>, vector<1x256xf32> -> vector<97x256xf32>
    %96 = arith.truncf %95 : vector<97x256xf32> to vector<97x256xbf16>
    %c144 = arith.constant 144 : index
    %c0_34 = arith.constant 0 : index
    %97 = vector.load %arg3[%c144, %c0_34] : memref<192x128xbf16, #tpu.memory_space<vmem>>, vector<8x97xbf16>
    %cst_35 = arith.constant dense<0.000000e+00> : vector<8x256xf32>
    %98 = tpu.matmul %97, %96, %cst_35 {dimension_numbers = #tpu.dot_dimension_numbers<[1], [0], [0], [1], [0, 0, 1, 1], [], []>} : vector<8x97xbf16>, vector<97x256xbf16>, vector<8x256xf32> -> vector<8x256xf32>
    %99 = tpu.concatenate %64, %32 in 0 : vector<8x256xf32>, vector<1x256xf32> -> vector<9x256xf32>
    %100 = arith.truncf %99 : vector<9x256xf32> to vector<9x256xbf16>
    %c160 = arith.constant 160 : index
    %c0_36 = arith.constant 0 : index
    %101 = vector.load %arg3[%c160, %c0_36] : memref<192x128xbf16, #tpu.memory_space<vmem>>, vector<16x9xbf16>
    %cst_37 = arith.constant dense<0.000000e+00> : vector<16x256xf32>
    %102 = tpu.matmul %101, %100, %cst_37 {dimension_numbers = #tpu.dot_dimension_numbers<[1], [0], [0], [1], [0, 0, 1, 1], [], []>} : vector<16x9xbf16>, vector<9x256xbf16>, vector<16x256xf32> -> vector<16x256xf32>
    %cst_38 = arith.constant 0.000000e+00 : f32
    %103 = vector.broadcast %cst_38 : f32 to vector<16x256xf32>
    %104 = arith.maximumf %102, %103 : vector<16x256xf32>
    %105 = tpu.concatenate %104, %32 in 0 : vector<16x256xf32>, vector<1x256xf32> -> vector<17x256xf32>
    %106 = arith.truncf %105 : vector<17x256xf32> to vector<17x256xbf16>
    %c176 = arith.constant 176 : index
    %c0_39 = arith.constant 0 : index
    %107 = vector.load %arg3[%c176, %c0_39] : memref<192x128xbf16, #tpu.memory_space<vmem>>, vector<16x17xbf16>
    %cst_40 = arith.constant dense<0.000000e+00> : vector<16x256xf32>
    %108 = tpu.matmul %107, %106, %cst_40 {dimension_numbers = #tpu.dot_dimension_numbers<[1], [0], [0], [1], [0, 0, 1, 1], [], []>} : vector<16x17xbf16>, vector<17x256xbf16>, vector<16x256xf32> -> vector<16x256xf32>
    %109 = vector.extract_strided_slice %108 {offsets = [0, 0], sizes = [8, 256], strides = [1, 1]} : vector<16x256xf32> to vector<8x256xf32>
    %110 = vector.extract_strided_slice %108 {offsets = [8, 0], sizes = [8, 256], strides = [1, 1]} : vector<16x256xf32> to vector<8x256xf32>
    %111 = vector.broadcast %31 : vector<1x256xf32> to vector<8x256xf32>
    %112 = arith.mulf %110, %111 : vector<8x256xf32>
    %113 = arith.addf %109, %112 : vector<8x256xf32>
    %114 = arith.addf %98, %113 : vector<8x256xf32>
    %c0_41 = arith.constant 0 : index
    %c0_42 = arith.constant 0 : index
    %c0_43 = arith.constant 0 : index
    %115 = vector.load %arg4[%c0_41, %c0_42, %c0_43] : memref<1x8x256xf32, #tpu.memory_space<vmem>>, vector<1x8x256xf32>
    %116 = vector.shape_cast %115 : vector<1x8x256xf32> to vector<8x256xf32>
    %117 = vector.shape_cast %114 : vector<8x256xf32> to vector<1x8x256xf32>
    tpu.vector_store %arg4[%c0_41, %c0_42, %c0_43], %117 {strides = array<i32>} : memref<1x8x256xf32, #tpu.memory_space<vmem>>, vector<1x8x256xf32>,
    %c0_44 = arith.constant 0 : index
    %c0_45 = arith.constant 0 : index
    %c0_46 = arith.constant 0 : index
    %118 = vector.load %arg5[%c0_44, %c0_45, %c0_46] : memref<1x16x256xf32, #tpu.memory_space<vmem>>, vector<1x16x256xf32>
    %119 = vector.shape_cast %118 : vector<1x16x256xf32> to vector<16x256xf32>
    %120 = vector.shape_cast %60 : vector<16x256xf32> to vector<1x16x256xf32>
    tpu.vector_store %arg5[%c0_44, %c0_45, %c0_46], %120 {strides = array<i32>} : memref<1x16x256xf32, #tpu.memory_space<vmem>>, vector<1x16x256xf32>,
    return
  }
  func.func @transform_0(%arg0: i32) -> (i32, i32, i32) {
    %c0_i32 = arith.constant 0 : i32
    %c0_i32_0 = arith.constant 0 : i32
    %c0_i32_1 = arith.constant 0 : i32
    return %arg0, %c0_i32, %c0_i32_0 : i32, i32, i32
  }
  func.func @transform_1(%arg0: i32) -> (i32, i32, i32) {
    %c0_i32 = arith.constant 0 : i32
    %c0_i32_0 = arith.constant 0 : i32
    %c0_i32_1 = arith.constant 0 : i32
    return %arg0, %c0_i32, %c0_i32_0 : i32, i32, i32
  }
  func.func @transform_2(%arg0: i32) -> (i32, i32) {
    %c0_i32 = arith.constant 0 : i32
    %c0_i32_0 = arith.constant 0 : i32
    %c0_i32_1 = arith.constant 0 : i32
    return %c0_i32, %c0_i32_0 : i32, i32
  }
  func.func @transform_3(%arg0: i32) -> (i32, i32, i32) {
    %c0_i32 = arith.constant 0 : i32
    %c0_i32_0 = arith.constant 0 : i32
    %c0_i32_1 = arith.constant 0 : i32
    return %arg0, %c0_i32, %c0_i32_0 : i32, i32, i32
  }
  func.func @transform_4(%arg0: i32) -> (i32, i32, i32) {
    %c0_i32 = arith.constant 0 : i32
    %c0_i32_0 = arith.constant 0 : i32
    %c0_i32_1 = arith.constant 0 : i32
    return %arg0, %c0_i32, %c0_i32_0 : i32, i32, i32
  }
}

</mosaic_0001>

<bundles_post_ra>
// kernel: fwd.1
= control target key start
LH: loop header
LB: loop body
LE: loop exit
PB: predicated region body
PF: predicated region fallthrough
CT: control target
= control target key end

     0   :  { %s902_s17 = smov 1   ;;  %s903_s18 = smov 127   ;;  %v21_v2 = vlaneseq  ;;  %vm107_vm2 = vcmask 1043456   ;;  %v904_v9 = vmov 0.0   ;;  %vm108_vm6 = vcmask 1044480   ;;  %s1397_s0 = inlined_call_operand.vmem [shape: f32[1,8,256], index: 0, kind: input, shape index: {}]   ;;  %s1398_s2 = inlined_call_operand.vmem [shape: bf16[192,128], index: 2, kind: input, shape index: {}]   ;;  %s1399_s4 = inlined_call_operand.vmem [shape: f32[1,16,256], index: 4, kind: output, shape index: {1}]   ;;  %s1400_s1 = inlined_call_operand.vmem [shape: f32[1,8,256], index: 1, kind: input, shape index: {}]   ;;  %s1401_s3 = inlined_call_operand.vmem [shape: f32[1,8,256], index: 3, kind: output, shape index: {0}]  }
   0x1   :  { %v17_v0 = vld [vmem:[%s1397_s0] sm:$0xff]  ;;  %v18_v1 = vld [vmem:[%s1397_s0 + $0x8] sm:$0xff]  ;;  %v905_v14 = vmov 65535   ;;  %vm100_vm8 = vcmask 203776   ;;  %vm261_vm9 = vcmask 1040384   ;;  %v906_v55 = vmov 0  }
   0x2   :  { %64 = vrot.lane.b32.xlu1 %v17_v0, %s902_s17  ;;  %73 = vrot.lane.b32.xlu0 %v17_v0, %s903_s18  ;;  %v942_v3 = vand.u32 127, %v21_v2  ;;  %v109_v15 = vsel %vm107_vm2, 4294967295, %v905_v14  ;;  %v882_v33 = vld [vmem:[%s1398_s2] sm:$0xff]  ;;  %v883_v34 = vld [vmem:[%s1398_s2 + $0x8] sm:$0xff]  ;;  %v263_v56 = vsel %vm261_vm9, 65535, %v906_v55  ;;  %vm254_vm10 = vcmask 793600  }
   0x3   :  { %v970_v22 = vsel %vm108_vm6, %v109_v15, 0  ;;  %v1036_v57 = vand.u32 1.0|1.0, %v263_v56  ;;  %vm324_vm11 = vcmask 269312   ;;  %vm680_vm12 = vcmask 72704  }
   0x4   :  { %v23_v4 = vadd.s32 128, %v942_v3  ;;  %v946_v7 = vand.u32 15, %v942_v3  ;;  %vm77_vm3 = vcmp.lt.s32.totalorder %v942_v3, 127  ;;  %vm68_vm5 = vcmp.lt.s32.totalorder %v942_v3, 1 }
   0x5   :  { %vm731_vm13 = vcmask 138240  }
   0x6   :  { %v948_v8 = vand.u32 15, %v23_v4  ;;  %vm54_vm0 = vcmp.lt.s32.totalorder %v946_v7, 15  ;;  %vm48_vm4 = vcmp.gt.s32.totalorder %v946_v7, 0 }
   0x7   :  { %v953_v10 = vsel %vm54_vm0, 1.0, %v904_v9  ;;  %v966_v20 = vsel %vm48_vm4, 1.0, %v904_v9 }
   0x8   :  { %vm55_vm1 = vcmp.lt.s32.totalorder %v948_v8, 15  ;;  %vm49_vm7 = vcmp.gt.s32.totalorder %v948_v8, 0 }
   0x9   :  { %v955_v11 = vsel %vm55_vm1, 1.0, %v904_v9  ;;  %v972_v23 = vsel %vm49_vm7, 1.0, %v904_v9 }
   0xa   :  { %66 = vrot.lane.b32.xlu1 %v18_v1, %s902_s17  ;;  %75 = vrot.lane.b32.xlu0 %v18_v1, %s903_s18 }
  0x74   :  { %v65_v5 = vpop.permute.xlu1 %64  ;;  %v74_v6 = vpop.permute.xlu0 %73 }
  0x7c   :  { %v67_v12 = vpop.permute.xlu1 %66  ;;  %v76_v13 = vpop.permute.xlu0 %75 }
  0x7d   :  { %v78_v16 = vsel %vm77_vm3, %v74_v6, %v76_v13  ;;  %v79_v17 = vsel %vm77_vm3, %v76_v13, %v74_v6  ;;  %v70_v21 = vsel %vm68_vm5, %v67_v12, %v65_v5  ;;  %v69_v24 = vsel %vm68_vm5, %v65_v5, %v67_v12 }
  0x7e   :  { %v80_v18 = vmul.f32 %v953_v10, %v78_v16  ;;  %v81_v19 = vmul.f32 %v955_v11, %v79_v17  ;;  %v71_v27 = vmul.f32 %v966_v20, %v70_v21  ;;  %v72_v30 = vmul.f32 %v972_v23, %v69_v24 }
  0x80   :  { %v84_v25 = vpack.c.bf16 1.0, %v80_v18  ;;  %v85_v26 = vpack.c.bf16 1.0, %v81_v19  ;;  %v82_v31 = vpack.c.bf16 %v17_v0, %v71_v27  ;;  %v83_v32 = vpack.c.bf16 %v18_v1, %v72_v30 }
  0x82   :  { %v112_v28 = vand.u32 %v970_v22, %v84_v25  ;;  %v115_v29 = vand.u32 %v970_v22, %v85_v26 }
  0x84   :  { %123 = vmatpush.bf16.msra.mxu0 %v112_v28  ;;  %893 = vmatpush.bf16.msra.mxu2 %v112_v28 }
  0x85   :  { %142 = vmatpush.bf16.msra.mxu1 %v115_v29  ;;  %895 = vmatpush.bf16.msra.mxu3 %v115_v29 }
  0x88   :  { %124 = vmatpush.bf16.msra.mxu0 %v82_v31  ;;  %894 = vmatpush.bf16.msra.mxu2 %v82_v31 }
  0x89   :  { %143 = vmatpush.bf16.msra.mxu1 %v83_v32  ;;  %896 = vmatpush.bf16.msra.mxu3 %v83_v32 }
  0x8b   :  { %822 = vmatmul.msk.bf16.vlgmr.msra.gmra.mxu0 %vm100_vm8, %v882_v33  ;;  %823 = vmatmul.msk.bf16.vlgmr.msra.gmra.mxu2 %vm100_vm8, %v883_v34 }
  0x8c   :  { %824 = vmatmul.msk.bf16.vlgmr.msra.gmra.mxu1 %vm100_vm8, %v882_v33  ;;  %825 = vmatmul.msk.bf16.vlgmr.msra.gmra.mxu3 %vm100_vm8, %v883_v34 }
  0x8d   :  { %268 = vmatpush.bf16.msrb.mxu2 %v1036_v57  ;;  %287 = vmatpush.bf16.msrb.mxu3 %v1036_v57 }
  0x8e   :  { %333 = vmatpush.bf16.msrb.mxu0 %v1036_v57  ;;  %347 = vmatpush.bf16.msrb.mxu1 %v1036_v57 }
 0x108   :  { %v126_v35 = vpop.f32.mrf.mxu0 }
 0x109   :  { %v990_v36 = vmax.f32 %v126_v35, 0.0  ;;  %v145_v37 = vpop.f32.mrf.mxu1 }
 0x10a   :  { %v992_v38 = vmax.f32 %v145_v37, 0.0 }
 0x10b   :  { %195 = vrot.lane.b32.xlu2 %v990_v36, %s903_s18 }
 0x10c   :  { %203 = vrot.lane.b32.xlu1 %v992_v38, %s903_s18 }
 0x10e   :  { %v131_v39 = vpop.f32.mrf.mxu2 }
 0x10f   :  { %v150_v40 = vpop.f32.mrf.mxu3  ;;  %v998_v41 = vmax.f32 %v131_v39, 0.0 }
 0x110   :  { %v1000_v42 = vmax.f32 %v150_v40, 0.0  ;;  %v128_v43 = vpop.f32.mrf.mxu0 }
 0x111   :  { %v1002_v44 = vmax.f32 %v128_v43, 0.0  ;;  %v147_v45 = vpop.f32.mrf.mxu1 }
 0x112   :  { %v1004_v46 = vmax.f32 %v147_v45, 0.0  ;;  %207 = vrot.lane.b32.xlu0 %v1000_v42, %s903_s18 }
 0x113   :  { %199 = vrot.lane.b32.xlu2 %v998_v41, %s903_s18  ;;  %v231_v47 = vpack.c.bf16 %v1002_v44, %v990_v36 }
 0x114   :  { %v232_v48 = vpack.c.bf16 %v1004_v46, %v992_v38 }
 0x116   :  { %v133_v49 = vpop.f32.mrf.mxu2 }
 0x117   :  { %v152_v50 = vpop.f32.mrf.mxu3  ;;  %v161_v51 = vmax.f32 %v133_v49, 0.0 }
 0x118   :  { %v162_v52 = vmax.f32 %v152_v50, 0.0 }
 0x119   :  { %v233_v53 = vpack.c.bf16 %v161_v51, %v998_v41 }
 0x11a   :  { %209 = vrot.lane.b32.xlu1 %v162_v52, %s903_s18  ;;  %197 = vrot.lane.b32.xlu0 %v1002_v44, %s903_s18  ;;  %v234_v54 = vpack.c.bf16 %v162_v52, %v1000_v42 }
 0x11b   :  { %201 = vrot.lane.b32.xlu2 %v161_v51, %s903_s18 }
 0x122   :  { %163 = vrot.lane.b32.xlu1 %v990_v36, %s902_s17  ;;  %167 = vrot.lane.b32.xlu0 %v998_v41, %s902_s17 }
 0x123   :  { %205 = vrot.lane.b32.xlu2 %v1004_v46, %s903_s18 }
 0x12a   :  { %169 = vrot.lane.b32.xlu1 %v161_v51, %s902_s17  ;;  %177 = vrot.lane.b32.xlu0 %v162_v52, %s902_s17 }
 0x12b   :  { %175 = vrot.lane.b32.xlu2 %v1000_v42, %s902_s17 }
 0x132   :  { %173 = vrot.lane.b32.xlu1 %v1004_v46, %s902_s17  ;;  %171 = vrot.lane.b32.xlu0 %v992_v38, %s902_s17 }
 0x133   :  { %165 = vrot.lane.b32.xlu2 %v1002_v44, %s902_s17 }
 0x165   :  { %v196_v58 = vpop.permute.xlu2 %195 }
 0x16d   :  { %v200_v59 = vpop.permute.xlu2 %199 }
 0x175   :  { %v202_v60 = vpop.permute.xlu2 %201 }
 0x17d   :  { %v206_v63 = vpop.permute.xlu2 %205 }
 0x17e   :  { %v204_v61 = vpop.permute.xlu1 %203 }
 0x17f   :  { %v211_v17 = vsel %vm77_vm3, %v196_v58, %v204_v61  ;;  %v215_v18 = vsel %vm77_vm3, %v204_v61, %v196_v58 }
 0x180   :  { %v219_v26 = vmul.f32 %v953_v10, %v211_v17  ;;  %v220_v27 = vmul.f32 %v955_v11, %v215_v18 }
 0x184   :  { %v208_v62 = vpop.permute.xlu0 %207 }
 0x185   :  { %v213_v0 = vsel %vm77_vm3, %v200_v59, %v208_v62  ;;  %v217_v1 = vsel %vm77_vm3, %v208_v62, %v200_v59  ;;  %v176_v32 = vpop.permute.xlu2 %175  ;;  %v884_v59 = vld [vmem:[%s1398_s2 + $0x10] sm:$0xff] }
 0x186   :  { %v223_v13 = vmul.f32 %v953_v10, %v213_v0  ;;  %v224_v14 = vmul.f32 %v955_v11, %v217_v1 }
 0x18c   :  { %v210_v2 = vpop.permute.xlu1 %209  ;;  %v198_v4 = vpop.permute.xlu0 %197 }
 0x18d   :  { %v214_v5 = vsel %vm77_vm3, %v202_v60, %v210_v2  ;;  %v218_v6 = vsel %vm77_vm3, %v210_v2, %v202_v60  ;;  %v212_v9 = vsel %vm77_vm3, %v198_v4, %v206_v63  ;;  %v216_v12 = vsel %vm77_vm3, %v206_v63, %v198_v4  ;;  %v166_v51 = vpop.permute.xlu2 %165  ;;  %v885_v60 = vld [vmem:[%s1398_s2 + $0x18] sm:$0xff] }
 0x18e   :  { %v225_v15 = vmul.f32 %v953_v10, %v214_v5  ;;  %v226_v16 = vmul.f32 %v955_v11, %v218_v6  ;;  %v221_v19 = vmul.f32 %v953_v10, %v212_v9  ;;  %v222_v21 = vmul.f32 %v955_v11, %v216_v12 }
 0x190   :  { %v237_v24 = vpack.c.bf16 %v225_v15, %v223_v13  ;;  %v238_v25 = vpack.c.bf16 %v226_v16, %v224_v14  ;;  %v235_v30 = vpack.c.bf16 %v221_v19, %v219_v26  ;;  %v236_v31 = vpack.c.bf16 %v222_v21, %v220_v27 }
 0x192   :  { %269 = vmatpush.bf16.msrb.mxu2 %v237_v24  ;;  %288 = vmatpush.bf16.msrb.mxu3 %v238_v25  ;;  %v886_v25 = vld [vmem:[%s1398_s2 + $0x20] sm:$0xff] }
 0x194   :  { %v164_v28 = vpop.permute.xlu1 %163  ;;  %v168_v29 = vpop.permute.xlu0 %167 }
 0x195   :  { %v185_v33 = vsel %vm68_vm5, %v176_v32, %v168_v29  ;;  %v181_v34 = vsel %vm68_vm5, %v168_v29, %v176_v32  ;;  %v20_v29 = vld [vmem:[%s1400_s1 + $0x8] sm:$0xff] }
 0x196   :  { %270 = vmatpush.bf16.msrb.mxu2 %v235_v30  ;;  %289 = vmatpush.bf16.msrb.mxu3 %v236_v31  ;;  %v191_v39 = vmul.f32 %v966_v20, %v185_v33  ;;  %v192_v42 = vmul.f32 %v972_v23, %v181_v34 }
 0x19a   :  { %271 = vmatpush.bf16.msrb.mxu2 %v233_v53  ;;  %290 = vmatpush.bf16.msrb.mxu3 %v234_v54 }
 0x19c   :  { %v170_v35 = vpop.permute.xlu1 %169  ;;  %v178_v37 = vpop.permute.xlu0 %177 }
 0x19d   :  { %v182_v40 = vsel %vm68_vm5, %v170_v35, %v178_v37  ;;  %v186_v41 = vsel %vm68_vm5, %v178_v37, %v170_v35 }
 0x19e   :  { %v193_v43 = vmul.f32 %v966_v20, %v186_v41  ;;  %v194_v45 = vmul.f32 %v972_v23, %v182_v40  ;;  %272 = vmatpush.bf16.msrb.mxu2 %v231_v47  ;;  %291 = vmatpush.bf16.msrb.mxu3 %v232_v48 }
 0x1a0   :  { %v229_v49 = vpack.c.bf16 %v193_v43, %v191_v39  ;;  %v230_v50 = vpack.c.bf16 %v194_v45, %v192_v42 }
 0x1a2   :  { %273 = vmatpush.bf16.msrb.mxu2 %v229_v49  ;;  %292 = vmatpush.bf16.msrb.mxu3 %v230_v50 }
 0x1a4   :  { %v174_v52 = vpop.permute.xlu1 %173  ;;  %v172_v53 = vpop.permute.xlu0 %171 }
 0x1a5   :  { %v180_v54 = vsel %vm68_vm5, %v166_v51, %v174_v52  ;;  %v184_v55 = vsel %vm68_vm5, %v174_v52, %v166_v51  ;;  %v179_v36 = vsel %vm68_vm5, %v164_v28, %v172_v53  ;;  %v183_v38 = vsel %vm68_vm5, %v172_v53, %v164_v28  ;;  %v19_v28 = vld [vmem:[%s1400_s1] sm:$0xff] }
 0x1a6   :  { %v189_v44 = vmul.f32 %v966_v20, %v184_v55  ;;  %v190_v46 = vmul.f32 %v972_v23, %v180_v54  ;;  %v187_v47 = vmul.f32 %v966_v20, %v183_v38  ;;  %v188_v48 = vmul.f32 %v972_v23, %v179_v36 }
 0x1a8   :  { %v227_v56 = vpack.c.bf16 %v189_v44, %v187_v47  ;;  %v228_v58 = vpack.c.bf16 %v190_v46, %v188_v48 }
 0x1aa   :  { %274 = vmatpush.bf16.msrb.mxu2 %v227_v56  ;;  %293 = vmatpush.bf16.msrb.mxu3 %v228_v58 }
 0x1ad   :  { %834 = vmatmul.msk.bf16.vlgmr.msrb.gmra.mxu2 %vm254_vm10, %v884_v59  ;;  %836 = vmatmul.msk.bf16.vlgmr.msrb.gmra.mxu3 %vm254_vm10, %v884_v59  ;;  %v887_v59 = vld [vmem:[%s1398_s2 + $0x28] sm:$0xff] }
 0x1ae   :  { %549 = vmatpush.bf16.msra.mxu2 %v1036_v57  ;;  %568 = vmatpush.bf16.msra.mxu3 %v1036_v57 }
 0x1bd   :  { %835 = vmatmul.msk.bf16.gmra.mxu2 %vm254_vm10, %v885_v60  ;;  %837 = vmatmul.msk.bf16.gmra.mxu3 %vm254_vm10, %v885_v60 }
 0x230   :  { %v276_v61 = vpop.f32.mrf.mxu2  ;;  %v295_v62 = vpop.f32.mrf.mxu3 }
 0x231   :  { %v305_v18 = vmax.f32 %v276_v61, 0.0  ;;  %v306_v19 = vmax.f32 %v295_v62, 0.0 }
 0x238   :  { %v278_v63 = vpop.f32.mrf.mxu2  ;;  %v297_v0 = vpop.f32.mrf.mxu3 }
 0x239   :  { %v307_v14 = vmax.f32 %v278_v63, 0.0  ;;  %v308_v15 = vmax.f32 %v297_v0, 0.0 }
 0x23b   :  { %v313_v21 = vpack.c.bf16 %v307_v14, %v305_v18  ;;  %v314_v24 = vpack.c.bf16 %v308_v15, %v306_v19 }
 0x240   :  { %v281_v1 = vpop.f32.mrf.mxu2  ;;  %v300_v2 = vpop.f32.mrf.mxu3 }
 0x241   :  { %v309_v6 = vmax.f32 %v281_v1, 0.0  ;;  %v310_v9 = vmax.f32 %v300_v2, 0.0 }
 0x248   :  { %v283_v4 = vpop.f32.mrf.mxu2  ;;  %v302_v5 = vpop.f32.mrf.mxu3 }
 0x249   :  { %v311_v12 = vmax.f32 %v283_v4, 0.0  ;;  %v312_v13 = vmax.f32 %v302_v5, 0.0 }
 0x24b   :  { %v315_v16 = vpack.c.bf16 %v311_v12, %v309_v6  ;;  %v316_v17 = vpack.c.bf16 %v312_v13, %v310_v9 }
 0x24d   :  { %334 = vmatpush.bf16.msrb.mxu0 %v315_v16  ;;  %348 = vmatpush.bf16.msrb.mxu1 %v316_v17 }
 0x251   :  { %335 = vmatpush.bf16.msrb.mxu0 %v313_v21  ;;  %349 = vmatpush.bf16.msrb.mxu1 %v314_v24 }
 0x254   :  { %842 = vmatmul.msk.bf16.vlgmr.msrb.gmra.mxu0 %vm324_vm11, %v886_v25  ;;  %843 = vmatmul.msk.bf16.vlgmr.msrb.gmra.mxu1 %vm324_vm11, %v886_v25 }
 0x2d1   :  { %v337_v26 = vpop.f32.mrf.mxu0  ;;  %v351_v27 = vpop.f32.mrf.mxu1 }
 0x2d2   :  { %798 = vst [vmem:[%s1399_s4] sm:$0xff] %v337_v26 }
 0x2d3   :  { %799 = vst [vmem:[%s1399_s4 + $0x8] sm:$0xff] %v351_v27 }
 0x2d9   :  { %v339_v30 = vpop.f32.mrf.mxu0  ;;  %v353_v31 = vpop.f32.mrf.mxu1 }
 0x2da   :  { %v356_v32 = vmul.f32 %v339_v30, %v19_v28  ;;  %800 = vst [vmem:[%s1399_s4 + $0x10] sm:$0xff] %v339_v30  ;;  %v357_v33 = vmul.f32 %v353_v31, %v20_v29 }
 0x2db   :  { %801 = vst [vmem:[%s1399_s4 + $0x18] sm:$0xff] %v353_v31 }
 0x2dc   :  { %v358_v34 = vadd.f32 %v356_v32, %v337_v26  ;;  %v359_v35 = vadd.f32 %v357_v33, %v351_v27 }
 0x2de   :  { %370 = vrot.lane.b32.xlu0 %v359_v35, %s903_s18  ;;  %360 = vrot.lane.b32.xlu1 %v358_v34, %s902_s17  ;;  %v671_v44 = vpack.c.bf16 1.0, %v358_v34  ;;  %v672_v46 = vpack.c.bf16 1.0, %v359_v35 }
 0x2df   :  { %368 = vrot.lane.b32.xlu2 %v358_v34, %s903_s18 }
 0x2e0   :  { %v685_v56 = vand.u32 %v671_v44, %v970_v22  ;;  %v688_v58 = vand.u32 %v672_v46, %v970_v22 }
 0x2e7   :  { %362 = vrot.lane.b32.xlu2 %v359_v35, %s902_s17 }
 0x339   :  { %v369_v37 = vpop.permute.xlu2 %368 }
 0x341   :  { %v363_v43 = vpop.permute.xlu2 %362 }
 0x350   :  { %v371_v39 = vpop.permute.xlu0 %370  ;;  %v361_v40 = vpop.permute.xlu1 %360 }
 0x351   :  { %v372_v41 = vsel %vm77_vm3, %v369_v37, %v371_v39  ;;  %v373_v42 = vsel %vm77_vm3, %v371_v39, %v369_v37  ;;  %v364_v50 = vsel %vm68_vm5, %v361_v40, %v363_v43  ;;  %v365_v51 = vsel %vm68_vm5, %v363_v43, %v361_v40 }
 0x352   :  { %v374_v45 = vmul.f32 %v953_v10, %v372_v41  ;;  %v375_v49 = vmul.f32 %v955_v11, %v373_v42  ;;  %v366_v36 = vmul.f32 %v966_v20, %v365_v51  ;;  %v367_v38 = vmul.f32 %v972_v23, %v364_v50 }
 0x354   :  { %v378_v52 = vpack.c.bf16 1.0, %v374_v45  ;;  %v379_v53 = vpack.c.bf16 1.0, %v375_v49  ;;  %v376_v47 = vpack.c.bf16 %v358_v34, %v366_v36  ;;  %v377_v48 = vpack.c.bf16 %v359_v35, %v367_v38 }
 0x356   :  { %v401_v54 = vand.u32 %v378_v52, %v970_v22  ;;  %v404_v55 = vand.u32 %v379_v53, %v970_v22  ;;  %v888_v22 = vld [vmem:[%s1398_s2 + $0x30] sm:$0xff] }
 0x358   :  { %412 = vmatpush.bf16.msra.mxu0 %v401_v54  ;;  %431 = vmatpush.bf16.msra.mxu1 %v404_v55 }
 0x35c   :  { %413 = vmatpush.bf16.msra.mxu0 %v376_v47  ;;  %432 = vmatpush.bf16.msra.mxu1 %v377_v48 }
 0x35f   :  { %852 = vmatmul.msk.bf16.vlgmr.msra.gmra.mxu0 %vm100_vm8, %v887_v59  ;;  %854 = vmatmul.msk.bf16.vlgmr.msra.gmra.mxu1 %vm100_vm8, %v887_v59 }
 0x360   :  { %697 = vmatpush.bf16.msrb.mxu0 %v685_v56  ;;  %711 = vmatpush.bf16.msrb.mxu1 %v688_v58 }
 0x364   :  { %771 = vmatpush.bf16.msra.mxu0 %v1036_v57  ;;  %784 = vmatpush.bf16.msra.mxu1 %v1036_v57 }
 0x36f   :  { %853 = vmatmul.msk.bf16.gmra.mxu0 %vm100_vm8, %v888_v22  ;;  %855 = vmatmul.msk.bf16.gmra.mxu1 %vm100_vm8, %v888_v22 }
 0x3dc   :  { %v415_v60 = vpop.f32.mrf.mxu0  ;;  %v434_v61 = vpop.f32.mrf.mxu1 }
 0x3dd   :  { %v1161_v62 = vmax.f32 %v415_v60, 0.0  ;;  %v1163_v63 = vmax.f32 %v434_v61, 0.0 }
 0x3df   :  { %484 = vrot.lane.b32.xlu1 %v1161_v62, %s903_s18  ;;  %492 = vrot.lane.b32.xlu0 %v1163_v63, %s903_s18 }
 0x3e4   :  { %v417_v0 = vpop.f32.mrf.mxu0  ;;  %v436_v1 = vpop.f32.mrf.mxu1 }
 0x3e5   :  { %v1169_v2 = vmax.f32 %v417_v0, 0.0  ;;  %v1171_v4 = vmax.f32 %v436_v1, 0.0 }
 0x3e7   :  { %486 = vrot.lane.b32.xlu2 %v1169_v2, %s903_s18  ;;  %v520_v5 = vpack.c.bf16 %v1169_v2, %v1161_v62  ;;  %v521_v6 = vpack.c.bf16 %v1171_v4, %v1163_v63 }
 0x3ec   :  { %v420_v9 = vpop.f32.mrf.mxu0  ;;  %v439_v12 = vpop.f32.mrf.mxu1 }
 0x3ed   :  { %v1179_v13 = vmax.f32 %v420_v9, 0.0  ;;  %v449_v14 = vmax.f32 %v439_v12, 0.0 }
 0x3ef   :  { %488 = vrot.lane.b32.xlu0 %v1179_v13, %s903_s18  ;;  %496 = vrot.lane.b32.xlu2 %v449_v14, %s903_s18 }
 0x3f4   :  { %v422_v15 = vpop.f32.mrf.mxu0  ;;  %v441_v16 = vpop.f32.mrf.mxu1 }
 0x3f5   :  { %v450_v17 = vmax.f32 %v422_v15, 0.0  ;;  %v451_v18 = vmax.f32 %v441_v16, 0.0 }
 0x3f7   :  { %490 = vrot.lane.b32.xlu1 %v450_v17, %s903_s18  ;;  %456 = vrot.lane.b32.xlu2 %v1179_v13, %s902_s17  ;;  %v522_v19 = vpack.c.bf16 %v450_v17, %v1179_v13  ;;  %v523_v21 = vpack.c.bf16 %v451_v18, %v449_v14 }
 0x3f8   :  { %498 = vrot.lane.b32.xlu0 %v451_v18, %s903_s18 }
 0x3ff   :  { %494 = vrot.lane.b32.xlu1 %v1171_v4, %s903_s18  ;;  %466 = vrot.lane.b32.xlu2 %v451_v18, %s902_s17 }
 0x400   :  { %452 = vrot.lane.b32.xlu0 %v1161_v62, %s902_s17 }
 0x407   :  { %464 = vrot.lane.b32.xlu1 %v449_v14, %s902_s17  ;;  %460 = vrot.lane.b32.xlu2 %v1163_v63, %s902_s17 }
 0x408   :  { %458 = vrot.lane.b32.xlu0 %v450_v17, %s902_s17 }
 0x40f   :  { %454 = vrot.lane.b32.xlu1 %v1169_v2, %s902_s17 }
 0x410   :  { %462 = vrot.lane.b32.xlu0 %v1171_v4, %s902_s17 }
 0x441   :  { %v487_v24 = vpop.permute.xlu2 %486 }
 0x449   :  { %v497_v28 = vpop.permute.xlu2 %496 }
 0x451   :  { %v493_v25 = vpop.permute.xlu0 %492  ;;  %v485_v26 = vpop.permute.xlu1 %484 }
 0x452   :  { %v457_v35 = vpop.permute.xlu2 %456  ;;  %v500_v45 = vsel %vm77_vm3, %v485_v26, %v493_v25  ;;  %v504_v49 = vsel %vm77_vm3, %v493_v25, %v485_v26  ;;  %v890_v25 = vld [vmem:[%s1398_s2 + $0x40] sm:$0xff]  ;;  %v891_v26 = vld [vmem:[%s1398_s2 + $0x50] sm:$0xff] }
 0x453   :  { %v508_v54 = vmul.f32 %v953_v10, %v500_v45  ;;  %v509_v55 = vmul.f32 %v955_v11, %v504_v49  ;;  %872 = vmatmul.msk.bf16.vlgmr.msrb.gmra.mxu0 %vm680_vm12, %v891_v26  ;;  %873 = vmatmul.msk.bf16.vlgmr.msrb.gmra.mxu1 %vm680_vm12, %v891_v26 }
 0x45a   :  { %v467_v47 = vpop.permute.xlu2 %466 }
 0x461   :  { %v489_v27 = vpop.permute.xlu0 %488 }
 0x462   :  { %v502_v29 = vsel %vm77_vm3, %v489_v27, %v497_v28  ;;  %v506_v30 = vsel %vm77_vm3, %v497_v28, %v489_v27  ;;  %v461_v12 = vpop.permute.xlu2 %460 }
 0x463   :  { %v512_v37 = vmul.f32 %v953_v10, %v502_v29  ;;  %v513_v39 = vmul.f32 %v955_v11, %v506_v30 }
 0x469   :  { %v491_v31 = vpop.permute.xlu1 %490 }
 0x46a   :  { %v499_v32 = vpop.permute.xlu0 %498 }
 0x46b   :  { %v503_v33 = vsel %vm77_vm3, %v491_v31, %v499_v32  ;;  %v507_v34 = vsel %vm77_vm3, %v499_v32, %v491_v31 }
 0x46c   :  { %v514_v40 = vmul.f32 %v953_v10, %v503_v33  ;;  %v515_v41 = vmul.f32 %v955_v11, %v507_v34 }
 0x46e   :  { %v526_v42 = vpack.c.bf16 %v514_v40, %v512_v37  ;;  %v527_v43 = vpack.c.bf16 %v515_v41, %v513_v39 }
 0x470   :  { %550 = vmatpush.bf16.msra.mxu2 %v526_v42  ;;  %569 = vmatpush.bf16.msra.mxu3 %v527_v43 }
 0x471   :  { %v495_v50 = vpop.permute.xlu1 %494 }
 0x472   :  { %v501_v51 = vsel %vm77_vm3, %v487_v24, %v495_v50  ;;  %v505_v52 = vsel %vm77_vm3, %v495_v50, %v487_v24  ;;  %v453_v53 = vpop.permute.xlu0 %452  ;;  %v889_v24 = vld [vmem:[%s1398_s2 + $0x38] sm:$0xff] }
 0x473   :  { %v510_v36 = vmul.f32 %v953_v10, %v501_v51  ;;  %v511_v38 = vmul.f32 %v955_v11, %v505_v52  ;;  %v468_v13 = vsel %vm68_vm5, %v453_v53, %v461_v12  ;;  %v472_v14 = vsel %vm68_vm5, %v461_v12, %v453_v53 }
 0x474   :  { %v476_v63 = vmul.f32 %v966_v20, %v472_v14  ;;  %v477_v2 = vmul.f32 %v972_v23, %v468_v13 }
 0x475   :  { %v524_v44 = vpack.c.bf16 %v510_v36, %v508_v54  ;;  %v525_v46 = vpack.c.bf16 %v511_v38, %v509_v55 }
 0x477   :  { %551 = vmatpush.bf16.msra.mxu2 %v524_v44  ;;  %570 = vmatpush.bf16.msra.mxu3 %v525_v46 }
 0x479   :  { %v465_v48 = vpop.permute.xlu1 %464 }
 0x47a   :  { %v474_v56 = vsel %vm68_vm5, %v465_v48, %v457_v35  ;;  %v459_v58 = vpop.permute.xlu0 %458  ;;  %v470_v59 = vsel %vm68_vm5, %v457_v35, %v465_v48 }
 0x47b   :  { %v471_v22 = vsel %vm68_vm5, %v459_v58, %v467_v47  ;;  %v475_v60 = vsel %vm68_vm5, %v467_v47, %v459_v58  ;;  %552 = vmatpush.bf16.msra.mxu2 %v522_v19  ;;  %571 = vmatpush.bf16.msra.mxu3 %v523_v21  ;;  %v480_v61 = vmul.f32 %v966_v20, %v474_v56  ;;  %v892_v56 = vld [vmem:[%s1398_s2 + $0x58] sm:$0xff] }
 0x47c   :  { %v482_v0 = vmul.f32 %v966_v20, %v475_v60  ;;  %v481_v1 = vmul.f32 %v972_v23, %v470_v59  ;;  %v483_v9 = vmul.f32 %v972_v23, %v471_v22 }
 0x47e   :  { %v518_v16 = vpack.c.bf16 %v482_v0, %v480_v61  ;;  %v519_v18 = vpack.c.bf16 %v483_v9, %v481_v1 }
 0x47f   :  { %553 = vmatpush.bf16.msra.mxu2 %v520_v5  ;;  %572 = vmatpush.bf16.msra.mxu3 %v521_v6 }
 0x481   :  { %v455_v15 = vpop.permute.xlu1 %454 }
 0x482   :  { %v463_v17 = vpop.permute.xlu0 %462 }
 0x483   :  { %v469_v19 = vsel %vm68_vm5, %v455_v15, %v463_v17  ;;  %v473_v62 = vsel %vm68_vm5, %v463_v17, %v455_v15  ;;  %554 = vmatpush.bf16.msra.mxu2 %v518_v16  ;;  %573 = vmatpush.bf16.msra.mxu3 %v519_v18 }
 0x484   :  { %v478_v4 = vmul.f32 %v966_v20, %v473_v62  ;;  %v479_v5 = vmul.f32 %v972_v23, %v469_v19 }
 0x486   :  { %v516_v6 = vpack.c.bf16 %v478_v4, %v476_v63  ;;  %v517_v21 = vpack.c.bf16 %v479_v5, %v477_v2 }
 0x488   :  { %555 = vmatpush.bf16.msra.mxu2 %v516_v6  ;;  %574 = vmatpush.bf16.msra.mxu3 %v517_v21 }
 0x48b   :  { %864 = vmatmul.msk.bf16.vlgmr.msra.gmra.mxu2 %vm254_vm10, %v889_v24  ;;  %866 = vmatmul.msk.bf16.vlgmr.msra.gmra.mxu3 %vm254_vm10, %v889_v24 }
 0x48c   :  { %741 = vmatpush.bf16.msrb.mxu2 %v1036_v57  ;;  %755 = vmatpush.bf16.msrb.mxu3 %v1036_v57 }
 0x49b   :  { %865 = vmatmul.msk.bf16.gmra.mxu2 %vm254_vm10, %v890_v25  ;;  %867 = vmatmul.msk.bf16.gmra.mxu3 %vm254_vm10, %v890_v25 }
 0x4d0   :  { %v713_v52 = vpop.f32.mrf.mxu1  ;;  %v699_v53 = vpop.f32.mrf.mxu0 }
 0x4d1   :  { %v719_v54 = vmax.f32 %v713_v52, 0.0  ;;  %v718_v55 = vmax.f32 %v699_v53, 0.0 }
 0x4d8   :  { %v715_v36 = vpop.f32.mrf.mxu1  ;;  %v701_v44 = vpop.f32.mrf.mxu0 }
 0x4d9   :  { %v721_v38 = vmax.f32 %v715_v36, 0.0  ;;  %v720_v46 = vmax.f32 %v701_v44, 0.0 }
 0x4db   :  { %v723_v47 = vpack.c.bf16 %v721_v38, %v719_v54  ;;  %v722_v48 = vpack.c.bf16 %v720_v46, %v718_v55 }
 0x4dd   :  { %756 = vmatpush.bf16.msrb.mxu3 %v723_v47  ;;  %742 = vmatpush.bf16.msrb.mxu2 %v722_v48  ;;  %v670_v47 = vld [vmem:[%s1398_s2 + $0x48] sm:$0xf] }
 0x4e0   :  { %878 = vmatmul.msk.bf16.vlgmr.msrb.gmra.mxu2 %vm731_vm13, %v892_v56  ;;  %879 = vmatmul.msk.bf16.vlgmr.msrb.gmra.mxu3 %vm731_vm13, %v892_v56  ;;  %v60_v56 = vcvt.s32.f32 %v946_v7 }
 0x50e   :  { %v557_v57 = vpop.f32.mrf.mxu2  ;;  %v576_v27 = vpop.f32.mrf.mxu3 }
 0x50f   :  { %v1271_v28 = vmax.f32 %v557_v57, 0.0  ;;  %v1273_v29 = vmax.f32 %v576_v27, 0.0 }
 0x511   :  { %634 = vrot.lane.b32.xlu1 %v1273_v29, %s903_s18  ;;  %626 = vrot.lane.b32.xlu2 %v1271_v28, %s903_s18 }
 0x516   :  { %v559_v30 = vpop.f32.mrf.mxu2  ;;  %v578_v31 = vpop.f32.mrf.mxu3 }
 0x517   :  { %v1279_v32 = vmax.f32 %v559_v30, 0.0  ;;  %v1281_v33 = vmax.f32 %v578_v31, 0.0 }
 0x519   :  { %628 = vrot.lane.b32.xlu0 %v1279_v32, %s903_s18  ;;  %v662_v34 = vpack.c.bf16 %v1279_v32, %v1271_v28  ;;  %v663_v35 = vpack.c.bf16 %v1281_v33, %v1273_v29 }
 0x51e   :  { %v562_v37 = vpop.f32.mrf.mxu2  ;;  %v581_v39 = vpop.f32.mrf.mxu3 }
 0x51f   :  { %v1289_v40 = vmax.f32 %v562_v37, 0.0  ;;  %v1291_v41 = vmax.f32 %v581_v39, 0.0 }
 0x521   :  { %630 = vrot.lane.b32.xlu1 %v1289_v40, %s903_s18  ;;  %638 = vrot.lane.b32.xlu0 %v1291_v41, %s903_s18 }
 0x526   :  { %v564_v42 = vpop.f32.mrf.mxu2  ;;  %v583_v43 = vpop.f32.mrf.mxu3 }
 0x527   :  { %v1297_v45 = vmax.f32 %v564_v42, 0.0  ;;  %v1299_v49 = vmax.f32 %v583_v43, 0.0 }
 0x529   :  { %632 = vrot.lane.b32.xlu2 %v1297_v45, %s903_s18  ;;  %598 = vrot.lane.b32.xlu0 %v1289_v40, %s902_s17  ;;  %v664_v50 = vpack.c.bf16 %v1297_v45, %v1289_v40  ;;  %v665_v51 = vpack.c.bf16 %v1299_v49, %v1291_v41 }
 0x52a   :  { %640 = vrot.lane.b32.xlu1 %v1299_v49, %s903_s18 }
 0x531   :  { %636 = vrot.lane.b32.xlu2 %v1281_v33, %s903_s18  ;;  %608 = vrot.lane.b32.xlu0 %v1299_v49, %s902_s17 }
 0x532   :  { %594 = vrot.lane.b32.xlu1 %v1271_v28, %s902_s17 }
 0x539   :  { %606 = vrot.lane.b32.xlu2 %v1291_v41, %s902_s17  ;;  %602 = vrot.lane.b32.xlu0 %v1273_v29, %s902_s17 }
 0x53a   :  { %600 = vrot.lane.b32.xlu1 %v1297_v45, %s902_s17 }
 0x541   :  { %596 = vrot.lane.b32.xlu2 %v1279_v32, %s902_s17 }
 0x542   :  { %604 = vrot.lane.b32.xlu1 %v1281_v33, %s902_s17 }
 0x563   :  { %v744_v3 = vpop.f32.mrf.mxu2  ;;  %v758_v48 = vpop.f32.mrf.mxu3 }
 0x56b   :  { %v627_v58 = vpop.permute.xlu2 %626 }
 0x583   :  { %v635_v59 = vpop.permute.xlu1 %634  ;;  %v633_v60 = vpop.permute.xlu2 %632 }
 0x584   :  { %v642_v4 = vsel %vm77_vm3, %v627_v58, %v635_v59  ;;  %v646_v5 = vsel %vm77_vm3, %v635_v59, %v627_v58  ;;  %v62_v58 = vmul.f32 0.0625, %v60_v56  ;;  %v746_v59 = vpop.f32.mrf.mxu2 }
 0x585   :  { %v650_v26 = vmul.f32 %v953_v10, %v642_v4  ;;  %v651_v57 = vmul.f32 %v955_v11, %v646_v5 }
 0x58b   :  { %v629_v22 = vpop.permute.xlu0 %628  ;;  %v637_v1 = vpop.permute.xlu2 %636 }
 0x58c   :  { %v643_v15 = vsel %vm77_vm3, %v629_v22, %v637_v1  ;;  %v647_v16 = vsel %vm77_vm3, %v637_v1, %v629_v22  ;;  %v760_v22 = vpop.f32.mrf.mxu3 }
 0x58d   :  { %v652_v6 = vmul.f32 %v953_v10, %v643_v15  ;;  %v653_v21 = vmul.f32 %v955_v11, %v647_v16 }
 0x58f   :  { %v666_v30 = vpack.c.bf16 %v652_v6, %v650_v26  ;;  %v667_v31 = vpack.c.bf16 %v653_v21, %v651_v57 }
 0x593   :  { %v631_v61 = vpop.permute.xlu1 %630  ;;  %v639_v0 = vpop.permute.xlu0 %638 }
 0x594   :  { %v644_v9 = vsel %vm77_vm3, %v631_v61, %v639_v0  ;;  %v648_v12 = vsel %vm77_vm3, %v639_v0, %v631_v61  ;;  %v607_v39 = vpop.permute.xlu2 %606 }
 0x595   :  { %v654_v19 = vmul.f32 %v953_v10, %v644_v9  ;;  %v655_v62 = vmul.f32 %v955_v11, %v648_v12 }
 0x59b   :  { %v599_v13 = vpop.permute.xlu0 %598 }
 0x59c   :  { %v641_v14 = vpop.permute.xlu1 %640  ;;  %v612_v40 = vsel %vm68_vm5, %v599_v13, %v607_v39  ;;  %v616_v41 = vsel %vm68_vm5, %v607_v39, %v599_v13  ;;  %v597_v36 = vpop.permute.xlu2 %596 }
 0x59d   :  { %v645_v17 = vsel %vm77_vm3, %v633_v60, %v641_v14  ;;  %v649_v18 = vsel %vm77_vm3, %v641_v14, %v633_v60  ;;  %v622_v43 = vmul.f32 %v966_v20, %v616_v41  ;;  %v623_v45 = vmul.f32 %v972_v23, %v612_v40 }
 0x59e   :  { %v656_v63 = vmul.f32 %v953_v10, %v645_v17  ;;  %v657_v2 = vmul.f32 %v955_v11, %v649_v18  ;;  %v763_v60 = vmul.f32 %v746_v59, %v62_v58 }
 0x5a0   :  { %v668_v24 = vpack.c.bf16 %v656_v63, %v654_v19  ;;  %v669_v25 = vpack.c.bf16 %v657_v2, %v655_v62  ;;  %v765_v0 = vadd.f32 %v763_v60, %v744_v3 }
 0x5a2   :  { %772 = vmatpush.bf16.msra.mxu0 %v668_v24  ;;  %785 = vmatpush.bf16.msra.mxu1 %v669_v25 }
 0x5a3   :  { %v609_v37 = vpop.permute.xlu0 %608 }
 0x5a4   :  { %v595_v27 = vpop.permute.xlu1 %594 }
 0x5a6   :  { %773 = vmatpush.bf16.msra.mxu0 %v666_v30  ;;  %786 = vmatpush.bf16.msra.mxu1 %v667_v31 }
 0x5aa   :  { %774 = vmatpush.bf16.msra.mxu0 %v664_v50  ;;  %787 = vmatpush.bf16.msra.mxu1 %v665_v51 }
 0x5ab   :  { %v603_v51 = vpop.permute.xlu0 %602 }
 0x5ac   :  { %v601_v10 = vpop.permute.xlu1 %600  ;;  %v610_v54 = vsel %vm68_vm5, %v595_v27, %v603_v51  ;;  %v614_v55 = vsel %vm68_vm5, %v603_v51, %v595_v27 }
 0x5ad   :  { %v613_v11 = vsel %vm68_vm5, %v601_v10, %v609_v37  ;;  %v617_v42 = vsel %vm68_vm5, %v609_v37, %v601_v10  ;;  %v618_v32 = vmul.f32 %v966_v20, %v614_v55  ;;  %v619_v33 = vmul.f32 %v972_v23, %v610_v54 }
 0x5ae   :  { %v624_v49 = vmul.f32 %v966_v20, %v617_v42  ;;  %v625_v50 = vmul.f32 %v972_v23, %v613_v11  ;;  %775 = vmatpush.bf16.msra.mxu0 %v662_v34  ;;  %788 = vmatpush.bf16.msra.mxu1 %v663_v35 }
 0x5b0   :  { %v660_v52 = vpack.c.bf16 %v624_v49, %v622_v43  ;;  %v661_v53 = vpack.c.bf16 %v625_v50, %v623_v45 }
 0x5b2   :  { %776 = vmatpush.bf16.msra.mxu0 %v660_v52  ;;  %789 = vmatpush.bf16.msra.mxu1 %v661_v53 }
 0x5b4   :  { %v605_v38 = vpop.permute.xlu1 %604 }
 0x5b5   :  { %v611_v28 = vsel %vm68_vm5, %v597_v36, %v605_v38  ;;  %v615_v29 = vsel %vm68_vm5, %v605_v38, %v597_v36 }
 0x5b6   :  { %v620_v34 = vmul.f32 %v966_v20, %v615_v29  ;;  %v621_v35 = vmul.f32 %v972_v23, %v611_v28  ;;  %v61_v20 = vcvt.s32.f32 %v948_v8 }
 0x5b8   :  { %v658_v44 = vpack.c.bf16 %v620_v34, %v618_v32  ;;  %v659_v46 = vpack.c.bf16 %v621_v35, %v619_v33  ;;  %v63_v23 = vmul.f32 0.0625, %v61_v20 }
 0x5ba   :  { %777 = vmatpush.bf16.msra.mxu0 %v658_v44  ;;  %790 = vmatpush.bf16.msra.mxu1 %v659_v46  ;;  %v764_v61 = vmul.f32 %v760_v22, %v63_v23 }
 0x5bc   :  { %v766_v1 = vadd.f32 %v764_v61, %v758_v48 }
 0x5bd   :  { %880 = vmatmul.msk.bf16.vlgmr.msra.gmra.mxu0 %vm254_vm10, %v670_v47  ;;  %881 = vmatmul.msk.bf16.vlgmr.msra.gmra.mxu1 %vm254_vm10, %v670_v47 }
 0x63a   :  { %v779_v9 = vpop.f32.mrf.mxu0  ;;  %v792_v12 = vpop.f32.mrf.mxu1 }
 0x63b   :  { %v780_v13 = vadd.f32 %v779_v9, %v765_v0  ;;  %v793_v14 = vadd.f32 %v792_v12, %v766_v1 }
 0x63d   :  { %796 = vst [vmem:[%s1401_s3] sm:$0xff] %v780_v13 }
 0x63e   :  { %797 = vst [vmem:[%s1401_s3 + $0x8] sm:$0xff] %v793_v14 }
 0x642   :  { %v781_v7 = vpop.f32.mrf.mxu0  ;;  %v794_v8 = vpop.f32.mrf.mxu1 }

</bundles_post_ra>
